<compile_context>
chip_gen: v7x
topology: tpu7x:2x2x1
jax: 0.10.0
libtpu: 0.0.40
codegen_flags: <defaults>
</compile_context>

<pallas_src>
import math

import jax
import jax.numpy as jnp
from jax.experimental import pallas as pl
from jax.experimental.pallas import tpu as pltpu


# ----------------------------- model parameters ------------------------------
# Defaults from LIFPopulation.__init__ (dt must be supplied; we use 1.0 ms).
V_TH = 0.0
V_REST = -70.0
V_RESET = -75.0
TAU_M = 10.0
R_M = 10.0
T_REF = 5.0
DT = 1.0
TAU_S = 10.0
TRACE_SCALE = 1.0

CUR_SCALE = 1e-3 * R_M / TAU_M * DT      # current -> dv per step
LEAK = DT / TAU_M                        # leak factor per step
TRACE_DECAY = math.exp(-DT / TAU_S)      # spike-trace decay per step


# --------------------------- VMEM-aware tile choice ---------------------------
def _vmem_capacity_bytes():
    try:
        cap = getattr(pltpu.get_tpu_info(), "vmem_capacity_bytes", None)
        if cap:
            return int(cap)
    except Exception:
        pass
    return 64 * 1024 * 1024   # v7x per-TC floor -> safe on every generation


def _vmem_limit_bytes():
    return int(_vmem_capacity_bytes() * 0.9)


# Conservative live bytes per neuron element: all streamed blocks
# double-buffered by the Pallas pipeline + f32 scratch for the fused kernel.
_LIVE_BYTES_PER_ELEM = 96


def _choose_row_tile(R, C):
    budget = int(_vmem_capacity_bytes() * 0.7)
    max_rows = budget // (_LIVE_BYTES_PER_ELEM * C)
    max_rows = max(8, (max_rows // 8) * 8)
    if R <= max_rows:
        # Whole array fits in one block (minimal per-step overhead).  For large
        # arrays split in two so both TensorCores of a v7x chip get work on the
        # "parallel" grid axis.
        if R % 16 == 0 and R * C * 4 >= (4 << 20) and (R // 2) >= 8:
            return R // 2
        return R
    for rt in range(max_rows, 7, -8):
        if R % rt == 0:
            return rt
    return 8   # TODO(synk): pad R to a multiple of 8 upstream if this path is hot.


# ---------------------------- single-step kernel ------------------------------
def lif_step_kernel(cur_ref, inj_ref, v_ref, s_ref, refr_ref, tr_ref,
                    v_out, s_out, refr_out, tr_out):
    v = v_ref[...]
    s_prev = s_ref[...] != 0                     # int8 spikes -> bool mask
    refr = refr_ref[...] - DT                    # refractory countdown

    # refractory_and_reset
    v = jnp.where(s_prev, V_RESET, v)
    refr = jnp.where(s_prev, T_REF, refr)

    # compute_potential (+ inject_v)
    v_temp = v + cur_ref[...] * CUR_SCALE
    v = jnp.where(refr <= 0.0, v_temp, v) + inj_ref[...]

    # compute_spike
    s_new = v > V_TH

    # compute_decay (leak toward rest)
    v = v - (v - V_REST) * LEAK

    # NeuralPopulation.forward: additive spike trace
    tr = tr_ref[...] * TRACE_DECAY + TRACE_SCALE * s_new.astype(jnp.float32)

    v_out[...] = v
    s_out[...] = s_new.astype(jnp.int8)
    refr_out[...] = refr
    tr_out[...] = tr


@jax.jit
def lif_step(current, inject_v, v, s, refractory, traces):
    """One LIF step. All arrays (R, C); f32 except spikes `s` which are int8.
    Returns (v, s, refractory, traces) new state (state is aliased in place)."""
    R, C = v.shape
    assert R % 8 == 0 and C % 128 == 0, "lay the population out as (R%8==0, C%128==0)"
    rt = _choose_row_tile(R, C)
    blk = pl.BlockSpec((rt, C), lambda i: (i, 0))

    out_shape = (
        jax.ShapeDtypeStruct((R, C), jnp.float32),   # v
        jax.ShapeDtypeStruct((R, C), jnp.int8),      # s
        jax.ShapeDtypeStruct((R, C), jnp.float32),   # refractory
        jax.ShapeDtypeStruct((R, C), jnp.float32),   # traces
    )
    return pl.pallas_call(
        lif_step_kernel,
        out_shape=out_shape,
        grid=(R // rt,),
        in_specs=[blk, blk, blk, blk, blk, blk],
        out_specs=(blk, blk, blk, blk),
        # update state in place: v, s, refractory, traces inputs alias outputs
        input_output_aliases={2: 0, 3: 1, 4: 2, 5: 3},
        compiler_params=pltpu.CompilerParams(
            dimension_semantics=("parallel",),
            vmem_limit_bytes=_vmem_limit_bytes()),
    )(current, inject_v, v, s, refractory, traces)


# ------------------------ fused multi-timestep kernel --------------------------
# State (v, s, refractory, traces) stays resident in VMEM scratch across the
# trailing time axis; only current[t] is streamed in and spikes[t] streamed out.
def lif_multi_step_kernel(cur_ref, inj_ref, v0_ref, s0_ref, refr0_ref, tr0_ref,
                          s_all_ref, v_out, refr_out, tr_out,
                          v_sc, s_sc, refr_sc, tr_sc):
    t = pl.program_id(1)

    @pl.when(t == 0)
    def _():   # (re)load initial state for this row block
        v_sc[...] = v0_ref[...]
        s_sc[...] = (s0_ref[...] != 0).astype(jnp.float32)
        refr_sc[...] = refr0_ref[...]
        tr_sc[...] = tr0_ref[...]

    v = v_sc[...]
    s_prev = s_sc[...] > 0.5
    refr = refr_sc[...] - DT

    v = jnp.where(s_prev, V_RESET, v)
    refr = jnp.where(s_prev, T_REF, refr)

    v_temp = v + cur_ref[0] * CUR_SCALE
    v = jnp.where(refr <= 0.0, v_temp, v) + inj_ref[...]

    s_new = v > V_TH
    v = v - (v - V_REST) * LEAK
    s_new_f = s_new.astype(jnp.float32)
    tr = tr_sc[...] * TRACE_DECAY + TRACE_SCALE * s_new_f

    # carry state in VMEM (note: on v5e the 4 scratch stores/step can become
    # the binding unit once HBM traffic is gone; acceptable trade-off here)
    v_sc[...] = v
    s_sc[...] = s_new_f
    refr_sc[...] = refr
    tr_sc[...] = tr

    s_all_ref[0] = s_new.astype(jnp.int8)        # per-step spikes (1 B/neuron)

    @pl.when(t == pl.num_programs(1) - 1)
    def _():   # final state written back once
        v_out[...] = v
        refr_out[...] = refr
        tr_out[...] = tr


@jax.jit
def lif_multi_step(current_seq, inject_v, v, s, refractory, traces):
    """T fused LIF steps. current_seq (T, R, C); state (R, C); spikes int8.
    Returns (spikes_per_step[T,R,C] int8, v_final, refractory_final, traces_final)."""
    T, R, C = current_seq.shape
    assert R % 8 == 0 and C % 128 == 0
    rt = _choose_row_tile(R, C)

    blk_state = pl.BlockSpec((rt, C), lambda i, t: (i, 0))
    blk_time = pl.BlockSpec((1, rt, C), lambda i, t: (t, i, 0))

    out_shape = (
        jax.ShapeDtypeStruct((T, R, C), jnp.int8),     # spikes per step
        jax.ShapeDtypeStruct((R, C), jnp.float32),     # v final
        jax.ShapeDtypeStruct((R, C), jnp.float32),     # refractory final
        jax.ShapeDtypeStruct((R, C), jnp.float32),     # traces final
    )
    return pl.pallas_call(
        lif_multi_step_kernel,
        out_shape=out_shape,
        grid=(R // rt, T),
        in_specs=[blk_time, blk_state, blk_state, blk_state, blk_state, blk_state],
        out_specs=(blk_time, blk_state, blk_state, blk_state),
        scratch_shapes=[pltpu.VMEM((rt, C), jnp.float32) for _ in range(4)],
        compiler_params=pltpu.CompilerParams(
            dimension_semantics=("parallel", "arbitrary"),
            vmem_limit_bytes=_vmem_limit_bytes()),
    )(current_seq, inject_v, v, s, refractory, traces)


# ----------------------------- pure-JAX reference ------------------------------
def lif_step_ref(current, inject_v, v, s_bool, refr, traces):
    refr = refr - DT
    v = jnp.where(s_bool, V_RESET, v)
    refr = jnp.where(s_bool, T_REF, refr)
    v_temp = v + current * CUR_SCALE
    v = jnp.where(refr <= 0.0, v_temp, v) + inject_v
    s_new = v > V_TH
    v = v - (v - V_REST) * LEAK
    traces = traces * TRACE_DECAY + TRACE_SCALE * s_new.astype(jnp.float32)
    return v, s_new, refr, traces


def lif_multi_step_ref(current_seq, inject_v, v, s_bool, refr, traces):
    spikes = []
    for t in range(current_seq.shape[0]):
        v, s_bool, refr, traces = lif_step_ref(current_seq[t], inject_v, v,
                                               s_bool, refr, traces)
        spikes.append(s_bool)
    return jnp.stack(spikes), v, refr, traces


# ------------------------------------ main -------------------------------------
if __name__ == "__main__":
    key = jax.random.PRNGKey(0)
    k1, k2, k3, k4, k5, k6, k7 = jax.random.split(key, 7)

    R, C, T = 16, 256, 4
    current = jax.random.uniform(k1, (R, C), jnp.float32, 0.0, 5000.0)
    inject_v = jax.random.uniform(k2, (R, C), jnp.float32, -1.0, 1.0)
    v = jax.random.uniform(k3, (R, C), jnp.float32, -80.0, -40.0)
    s_bool = jax.random.bernoulli(k4, 0.2, (R, C))
    s = s_bool.astype(jnp.int8)               # spikes kept as int8 end-to-end
    refractory = jax.random.uniform(k5, (R, C), jnp.float32, 0.0, 3.0)
    traces = jax.random.uniform(k6, (R, C), jnp.float32, 0.0, 1.0)
    current_seq = jax.random.uniform(k7, (T, R, C), jnp.float32, 0.0, 5000.0)

    # references (computed first; kernel inputs are never mutated by XLA anyway)
    v_r, s_r, refr_r, traces_r = lif_step_ref(current, inject_v, v, s_bool,
                                              refractory, traces)
    sall_r, vT_r, refrT_r, tracesT_r = lif_multi_step_ref(
        current_seq, inject_v, v, s_bool, refractory, traces)

    # single fused step
    v_n, s_n, refr_n, traces_n = lif_step(current, inject_v, v, s,
                                          refractory, traces)
    jax.block_until_ready((v_n, s_n, refr_n, traces_n))
    assert jnp.allclose(v_n, v_r, atol=1e-5, rtol=1e-5)
    assert bool(jnp.all((s_n != 0) == s_r))
    assert jnp.allclose(refr_n, refr_r, atol=1e-5, rtol=1e-5)
    assert jnp.allclose(traces_n, traces_r, atol=1e-5, rtol=1e-5)

    # fused T-step kernel with VMEM-resident state
    s_all, v_T, refr_T, traces_T = lif_multi_step(current_seq, inject_v, v, s,
                                                  refractory, traces)
    jax.block_until_ready((s_all, v_T, refr_T, traces_T))
    assert bool(jnp.all((s_all != 0) == sall_r))
    assert jnp.allclose(v_T, vT_r, atol=1e-5, rtol=1e-5)
    assert jnp.allclose(refr_T, refrT_r, atol=1e-5, rtol=1e-5)
    assert jnp.allclose(traces_T, tracesT_r, atol=1e-5, rtol=1e-5)

    print("KERNEL_OK")
</pallas_src>

<mosaic_0001>
module attributes {stable_mosaic.version = 11 : i64} {
  func.func @lif_step_kernel(%arg0: i32, %arg1: memref<16x256xf32, #tpu.memory_space<vmem>>, %arg2: memref<16x256xf32, #tpu.memory_space<vmem>>, %arg3: memref<16x256xf32, #tpu.memory_space<vmem>>, %arg4: memref<16x256xi8, #tpu.memory_space<vmem>>, %arg5: memref<16x256xf32, #tpu.memory_space<vmem>>, %arg6: memref<16x256xf32, #tpu.memory_space<vmem>>, %arg7: memref<16x256xf32, #tpu.memory_space<vmem>>, %arg8: memref<16x256xi8, #tpu.memory_space<vmem>>, %arg9: memref<16x256xf32, #tpu.memory_space<vmem>>, %arg10: memref<16x256xf32, #tpu.memory_space<vmem>>) attributes {dimension_semantics = [#tpu.dimension_semantics<parallel>], iteration_bounds = array<i64: 1>, scalar_prefetch = 0 : i64, scratch_operands = 0 : i64, tpu.core_type = #tpu.core_type<tc>, window_params = [{transform_indices = @transform_0, window_bounds = array<i64: 16, 256>}, {transform_indices = @transform_1, window_bounds = array<i64: 16, 256>}, {transform_indices = @transform_2, window_bounds = array<i64: 16, 256>}, {transform_indices = @transform_3, window_bounds = array<i64: 16, 256>}, {transform_indices = @transform_4, window_bounds = array<i64: 16, 256>}, {transform_indices = @transform_5, window_bounds = array<i64: 16, 256>}, {transform_indices = @transform_6, window_bounds = array<i64: 16, 256>}, {transform_indices = @transform_7, window_bounds = array<i64: 16, 256>}, {transform_indices = @transform_8, window_bounds = array<i64: 16, 256>}, {transform_indices = @transform_9, window_bounds = array<i64: 16, 256>}]} {
    %c0 = arith.constant 0 : index
    %c0_0 = arith.constant 0 : index
    %0 = vector.load %arg3[%c0, %c0_0] : memref<16x256xf32, #tpu.memory_space<vmem>>, vector<16x256xf32>
    %c0_1 = arith.constant 0 : index
    %c0_2 = arith.constant 0 : index
    %1 = vector.load %arg4[%c0_1, %c0_2] : memref<16x256xi8, #tpu.memory_space<vmem>>, vector<16x256xi8>
    %c0_i8 = arith.constant 0 : i8
    %2 = vector.broadcast %c0_i8 : i8 to vector<16x256xi8>
    %3 = arith.cmpi ne, %1, %2 : vector<16x256xi8>
    %c0_3 = arith.constant 0 : index
    %c0_4 = arith.constant 0 : index
    %4 = vector.load %arg5[%c0_3, %c0_4] : memref<16x256xf32, #tpu.memory_space<vmem>>, vector<16x256xf32>
    %cst = arith.constant 1.000000e+00 : f32
    %5 = vector.broadcast %cst : f32 to vector<16x256xf32>
    %6 = arith.subf %4, %5 : vector<16x256xf32>
    %cst_5 = arith.constant -7.500000e+01 : f32
    %7 = vector.broadcast %cst_5 : f32 to vector<16x256xf32>
    %8 = arith.select %3, %7, %0 : vector<16x256xi1>, vector<16x256xf32>
    %cst_6 = arith.constant 5.000000e+00 : f32
    %9 = vector.broadcast %cst_6 : f32 to vector<16x256xf32>
    %10 = arith.select %3, %9, %6 : vector<16x256xi1>, vector<16x256xf32>
    %c0_7 = arith.constant 0 : index
    %c0_8 = arith.constant 0 : index
    %11 = vector.load %arg1[%c0_7, %c0_8] : memref<16x256xf32, #tpu.memory_space<vmem>>, vector<16x256xf32>
    %cst_9 = arith.constant 1.000000e-03 : f32
    %12 = vector.broadcast %cst_9 : f32 to vector<16x256xf32>
    %13 = arith.mulf %11, %12 : vector<16x256xf32>
    %14 = arith.addf %8, %13 : vector<16x256xf32>
    %cst_10 = arith.constant 0.000000e+00 : f32
    %15 = vector.broadcast %cst_10 : f32 to vector<16x256xf32>
    %16 = arith.cmpf ole, %10, %15 : vector<16x256xf32>
    %17 = arith.select %16, %14, %8 : vector<16x256xi1>, vector<16x256xf32>
    %c0_11 = arith.constant 0 : index
    %c0_12 = arith.constant 0 : index
    %18 = vector.load %arg2[%c0_11, %c0_12] : memref<16x256xf32, #tpu.memory_space<vmem>>, vector<16x256xf32>
    %19 = arith.addf %17, %18 : vector<16x256xf32>
    %cst_13 = arith.constant 0.000000e+00 : f32
    %20 = vector.broadcast %cst_13 : f32 to vector<16x256xf32>
    %21 = arith.cmpf ogt, %19, %20 : vector<16x256xf32>
    %cst_14 = arith.constant -7.000000e+01 : f32
    %22 = vector.broadcast %cst_14 : f32 to vector<16x256xf32>
    %23 = arith.subf %19, %22 : vector<16x256xf32>
    %cst_15 = arith.constant 1.000000e-01 : f32
    %24 = vector.broadcast %cst_15 : f32 to vector<16x256xf32>
    %25 = arith.mulf %23, %24 : vector<16x256xf32>
    %26 = arith.subf %19, %25 : vector<16x256xf32>
    %c0_16 = arith.constant 0 : index
    %c0_17 = arith.constant 0 : index
    %27 = vector.load %arg6[%c0_16, %c0_17] : memref<16x256xf32, #tpu.memory_space<vmem>>, vector<16x256xf32>
    %cst_18 = arith.constant 0.904837429 : f32
    %28 = vector.broadcast %cst_18 : f32 to vector<16x256xf32>
    %29 = arith.mulf %27, %28 : vector<16x256xf32>
    %30 = arith.extui %21 : vector<16x256xi1> to vector<16x256xi32>
    %31 = arith.sitofp %30 : vector<16x256xi32> to vector<16x256xf32>
    %cst_19 = arith.constant 1.000000e+00 : f32
    %32 = vector.broadcast %cst_19 : f32 to vector<16x256xf32>
    %33 = arith.mulf %32, %31 : vector<16x256xf32>
    %34 = arith.addf %29, %33 : vector<16x256xf32>
    %c0_20 = arith.constant 0 : index
    %c0_21 = arith.constant 0 : index
    %35 = vector.load %arg7[%c0_20, %c0_21] : memref<16x256xf32, #tpu.memory_space<vmem>>, vector<16x256xf32>
    tpu.vector_store %arg7[%c0_20, %c0_21], %26 {strides = array<i32>} : memref<16x256xf32, #tpu.memory_space<vmem>>, vector<16x256xf32>,
    %36 = arith.extui %21 : vector<16x256xi1> to vector<16x256xi8>
    %c0_22 = arith.constant 0 : index
    %c0_23 = arith.constant 0 : index
    %37 = vector.load %arg8[%c0_22, %c0_23] : memref<16x256xi8, #tpu.memory_space<vmem>>, vector<16x256xi8>
    tpu.vector_store %arg8[%c0_22, %c0_23], %36 {strides = array<i32>} : memref<16x256xi8, #tpu.memory_space<vmem>>, vector<16x256xi8>,
    %c0_24 = arith.constant 0 : index
    %c0_25 = arith.constant 0 : index
    %38 = vector.load %arg9[%c0_24, %c0_25] : memref<16x256xf32, #tpu.memory_space<vmem>>, vector<16x256xf32>
    tpu.vector_store %arg9[%c0_24, %c0_25], %10 {strides = array<i32>} : memref<16x256xf32, #tpu.memory_space<vmem>>, vector<16x256xf32>,
    %c0_26 = arith.constant 0 : index
    %c0_27 = arith.constant 0 : index
    %39 = vector.load %arg10[%c0_26, %c0_27] : memref<16x256xf32, #tpu.memory_space<vmem>>, vector<16x256xf32>
    tpu.vector_store %arg10[%c0_26, %c0_27], %34 {strides = array<i32>} : memref<16x256xf32, #tpu.memory_space<vmem>>, vector<16x256xf32>,
    return
  }
  func.func @transform_0(%arg0: i32) -> (i32, i32) {
    %c0_i32 = arith.constant 0 : i32
    %c0_i32_0 = arith.constant 0 : i32
    return %arg0, %c0_i32 : i32, i32
  }
  func.func @transform_1(%arg0: i32) -> (i32, i32) {
    %c0_i32 = arith.constant 0 : i32
    %c0_i32_0 = arith.constant 0 : i32
    return %arg0, %c0_i32 : i32, i32
  }
  func.func @transform_2(%arg0: i32) -> (i32, i32) {
    %c0_i32 = arith.constant 0 : i32
    %c0_i32_0 = arith.constant 0 : i32
    return %arg0, %c0_i32 : i32, i32
  }
  func.func @transform_3(%arg0: i32) -> (i32, i32) {
    %c0_i32 = arith.constant 0 : i32
    %c0_i32_0 = arith.constant 0 : i32
    return %arg0, %c0_i32 : i32, i32
  }
  func.func @transform_4(%arg0: i32) -> (i32, i32) {
    %c0_i32 = arith.constant 0 : i32
    %c0_i32_0 = arith.constant 0 : i32
    return %arg0, %c0_i32 : i32, i32
  }
  func.func @transform_5(%arg0: i32) -> (i32, i32) {
    %c0_i32 = arith.constant 0 : i32
    %c0_i32_0 = arith.constant 0 : i32
    return %arg0, %c0_i32 : i32, i32
  }
  func.func @transform_6(%arg0: i32) -> (i32, i32) {
    %c0_i32 = arith.constant 0 : i32
    %c0_i32_0 = arith.constant 0 : i32
    return %arg0, %c0_i32 : i32, i32
  }
  func.func @transform_7(%arg0: i32) -> (i32, i32) {
    %c0_i32 = arith.constant 0 : i32
    %c0_i32_0 = arith.constant 0 : i32
    return %arg0, %c0_i32 : i32, i32
  }
  func.func @transform_8(%arg0: i32) -> (i32, i32) {
    %c0_i32 = arith.constant 0 : i32
    %c0_i32_0 = arith.constant 0 : i32
    return %arg0, %c0_i32 : i32, i32
  }
  func.func @transform_9(%arg0: i32) -> (i32, i32) {
    %c0_i32 = arith.constant 0 : i32
    %c0_i32_0 = arith.constant 0 : i32
    return %arg0, %c0_i32 : i32, i32
  }
}

</mosaic_0001>

<bundles_post_ra>
// kernel: lif_step.1
= control target key start
LH: loop header
LB: loop body
LE: loop exit
PB: predicated region body
PF: predicated region fallthrough
CT: control target
= control target key end

     0   :  { %15 = vsyncpa [#allocation3], 0  ;;  %s756_s0 = inlined_call_operand.vmem [shape: f32[16,256], index: 0, kind: input, shape index: {}]   ;;  %s757_s1 = inlined_call_operand.vmem [shape: f32[16,256], index: 1, kind: input, shape index: {}]   ;;  %s758_s2 = inlined_call_operand.hbm [shape: f32[16,256], index: 2, kind: input, shape index: {}, may-alias: {2,6}]   ;;  %s759_s3 = inlined_call_operand.hbm [shape: s8[16,256], index: 3, kind: input, shape index: {}, may-alias: {3,7}]   ;;  %s760_s4 = inlined_call_operand.hbm [shape: f32[16,256], index: 4, kind: input, shape index: {}, may-alias: {4,8}]   ;;  %s761_s5 = inlined_call_operand.hbm [shape: f32[16,256], index: 5, kind: input, shape index: {}, may-alias: {5,9}]   ;;  %s762_s6 = inlined_call_operand.hbm [shape: f32[16,256], index: 6, kind: output, shape index: {0}, may-alias: {2,6}]   ;;  %s763_s7 = inlined_call_operand.hbm [shape: s8[16,256], index: 7, kind: output, shape index: {1}, may-alias: {3,7}]   ;;  %s764_s8 = inlined_call_operand.hbm [shape: f32[16,256], index: 8, kind: output, shape index: {2}, may-alias: {4,8}]   ;;  %s765_s9 = inlined_call_operand.hbm [shape: f32[16,256], index: 9, kind: output, shape index: {3}, may-alias: {5,9}]  }
   0x1   :  { %16 = vsyncpa [#allocation6], 0 }
   0x2   :  { %17 = vsyncpa [#allocation9], 0 }
   0x3   :  { %18 = vsyncpa [#allocation4], 0 }
   0x4   :  { %19 = vsyncpa [#allocation12], 0 }
   0x5   :  { %20 = vsyncpa [#allocation15], 0  ;;  %s493_s30 = smov [#allocation5]   ;;  %s305_s13 = scalar_lea.hbm %s759_s3, 128 }
   0x6   :  { %s42_s10 = sshll.u32 %s493_s30, 4  ;;  %p306_p0 = scmp.ne.s32.totalorder %s759_s3, %s305_s13  ;;  %s43_s10 = int_to_ptr.vmem [resolvable:$true] %s42_s10 }
   0x7   :  { %p309_p1 = scmp.lt.u32.totalorder %s305_s13, %s759_s3 }
   0x9   :  { %p311_p2 = pnand %p309_p1, %p306_p0 }
   0xb   :  { %314 = shalt.err (!%p311_p2)
}
   0xc   :  { %s315_s18 = scalar_lea.vmem %s43_s10, 128  ;;  %p320_p4 = scmp.lt.s32.totalorder %s43_s10, %s43_s10 }
   0xd   :  { %p316_p3 = scmp.ne.s32.totalorder %s43_s10, %s315_s18  ;;  %p321_p5 = scmp.lt.s32.totalorder %s315_s18, %s315_s18 }
   0xf   :  { %p322_p6 = por %p321_p5, %p320_p4 }
  0x11   :  { %p323_p7 = pnand %p322_p6, %p316_p3 }
  0x13   :  { %326 = shalt.err (!%p323_p7)
}
  0x14   :  { %s494_s19 = smov 64   ;;  %s495_s20 = smov 4  }
  0x15   :  { %48 = dma.hbm_to_vmem [thread:$0]  %s759_s3, 128, %s43_s10, [#allocation6], %s494_s19, %s494_s19, %s495_s20  }
  0x16   :  { %s496_s23 = smov [#allocation2]   ;;  %s327_s27 = scalar_lea.hbm %s758_s2, 512 }
  0x17   :  { %s30_s24 = sshll.u32 %s496_s23, 4  ;;  %p328_p8 = scmp.ne.s32.totalorder %s758_s2, %s327_s27  ;;  %s31_s24 = int_to_ptr.vmem [resolvable:$true] %s30_s24 }
  0x18   :  { %p331_p9 = scmp.lt.u32.totalorder %s327_s27, %s758_s2 }
  0x1a   :  { %p333_p10 = pnand %p331_p9, %p328_p8 }
  0x1c   :  { %336 = shalt.err (!%p333_p10)
}
  0x1d   :  { %s337_s12 = scalar_lea.vmem %s31_s24, 512  ;;  %p342_p12 = scmp.lt.s32.totalorder %s31_s24, %s31_s24 }
  0x1e   :  { %p338_p11 = scmp.ne.s32.totalorder %s31_s24, %s337_s12  ;;  %p343_p13 = scmp.lt.s32.totalorder %s337_s12, %s337_s12 }
  0x20   :  { %p344_p0 = por %p343_p13, %p342_p12 }
  0x22   :  { %p345_p1 = pnand %p344_p0, %p338_p11 }
  0x24   :  { %348 = shalt.err (!%p345_p1)
}
  0x25   :  { %s497_s3 = smov 256   ;;  %s498_s10 = smov 16  }
  0x26   :  { %36 = dma.hbm_to_vmem [thread:$0]  %s758_s2, 512, %s31_s24, [#allocation3], %s497_s3, %s497_s3, %s498_s10  }
  0x27   :  { %s499_s15 = smov [#allocation7]   ;;  %s500_s17 = smov [#allocation8]  }
  0x28   :  { %s54_s16 = sshll.u32 %s499_s15, 4  ;;  %s66_s18 = sshll.u32 %s500_s17, 4  ;;  %s55_s16 = int_to_ptr.vmem [resolvable:$true] %s54_s16  ;;  %s587_s18 = int_to_ptr.vmem [resolvable:$true] %s66_s18 }
  0x29   :  { %s349_s23 = scalar_lea.hbm %s760_s4, 512 }
  0x2a   :  { %p350_p2 = scmp.ne.s32.totalorder %s760_s4, %s349_s23  ;;  %p353_p3 = scmp.lt.u32.totalorder %s349_s23, %s760_s4 }
  0x2c   :  { %p355_p4 = pnand %p353_p3, %p350_p2 }
  0x2e   :  { %358 = shalt.err (!%p355_p4)
}
  0x2f   :  { %s359_s2 = scalar_lea.vmem %s55_s16, 512  ;;  %p364_p6 = scmp.lt.s32.totalorder %s55_s16, %s55_s16 }
  0x30   :  { %p360_p5 = scmp.ne.s32.totalorder %s55_s16, %s359_s2  ;;  %p365_p7 = scmp.lt.s32.totalorder %s359_s2, %s359_s2 }
  0x32   :  { %p366_p8 = por %p365_p7, %p364_p6 }
  0x34   :  { %p367_p9 = pnand %p366_p8, %p360_p5 }
  0x36   :  { %370 = shalt.err (!%p367_p9)
}
  0x37   :  { %60 = dma.hbm_to_vmem [thread:$0]  %s760_s4, 512, %s55_s16, [#allocation6], %s497_s3, %s497_s3, %s498_s10  }
  0x38   :  { %s371_s12 = scalar_lea.hbm %s761_s5, 512 }
  0x39   :  { %p372_p10 = scmp.ne.s32.totalorder %s761_s5, %s371_s12  ;;  %p375_p11 = scmp.lt.u32.totalorder %s371_s12, %s761_s5 }
  0x3b   :  { %p377_p12 = pnand %p375_p11, %p372_p10 }
  0x3d   :  { %380 = shalt.err (!%p377_p12)
}
  0x3e   :  { %s381_s21 = scalar_lea.vmem %s587_s18, 512  ;;  %p386_p0 = scmp.lt.s32.totalorder %s587_s18, %s587_s18 }
  0x3f   :  { %p382_p13 = scmp.ne.s32.totalorder %s587_s18, %s381_s21  ;;  %p387_p1 = scmp.lt.s32.totalorder %s381_s21, %s381_s21 }
  0x41   :  { %p388_p2 = por %p387_p1, %p386_p0 }
  0x43   :  { %p389_p3 = pnand %p388_p2, %p382_p13 }
  0x45   :  { %392 = shalt.err (!%p389_p3)
}
  0x46   :  { %72 = dma.hbm_to_vmem [thread:$0]  %s761_s5, 512, %s587_s18, [#allocation9], %s497_s3, %s497_s3, %s498_s10  }
  0x47   :  { %481 = dma.done.wait [#allocation3], 512  }
  0x48   :  { %482 = vsyncadd [#allocation3], 4294966784 }
  0x49   :  { %483 = dma.done.wait [#allocation6], 640  }
  0x4a   :  { %484 = vsyncadd [#allocation6], 4294966656 }
  0x4b   :  { %485 = dma.done.wait [#allocation9], 512  }
  0x4c   :  { %486 = vsyncadd [#allocation9], 4294966784  ;;  %v91_v0 = vld [vmem:[#allocation5] sm:$0xf]  ;;  %v92_v1 = vld [vmem:[#allocation5 + $0x4] sm:$0xf] }
  0x4d   :  { %v87_v2 = vld [vmem:[#allocation2] sm:$0xff]  ;;  %v88_v3 = vld [vmem:[#allocation2 + $0x8] sm:$0xff]  ;;  %vm93_vm0 = vnez %v91_v0  ;;  %vm94_vm1 = vnez %v92_v1  ;;  %v96_v5 = vld [vmem:[#allocation7 + $0x8] sm:$0xff]  ;;  %v501_v12 = vmov 0   ;;  %v503_v0 = vmov 0.0   ;;  %s504_s15 = smov [#allocation14]  }
  0x4e   :  { %v95_v4 = vld [vmem:[#allocation7] sm:$0xff]  ;;  %v97_v6 = vld [vmem:[#allocation7 + $0x10] sm:$0xff]  ;;  %v89_v7 = vld [vmem:[#allocation2 + $0x10] sm:$0xff]  ;;  %v280_v10 = vadd.f32 -1.0, %v96_v5  ;;  %v103_v13 = vsel %vm93_vm0, 16843009, %v501_v12 }
  0x4f   :  { %v98_v8 = vld [vmem:[#allocation7 + $0x18] sm:$0xff]  ;;  %v279_v9 = vadd.f32 -1.0, %v95_v4  ;;  %v281_v11 = vadd.f32 -1.0, %v97_v6  ;;  %v104_v15 = vsel %vm94_vm1, 16843009, %v501_v12  ;;  %v105_v16 = vunpack.c.0.s8 %v103_v13  ;;  %v122_v19 = vld [vmem:[%s756_s0 + $0x8] sm:$0xff] }
  0x50   :  { %v282_v14 = vadd.f32 -1.0, %v98_v8  ;;  %v106_v17 = vunpack.c.1.s8 %v103_v13  ;;  %v121_v18 = vld [vmem:[%s756_s0] sm:$0xff]  ;;  %v123_v20 = vld [vmem:[%s756_s0 + $0x10] sm:$0xff]  ;;  %v90_v21 = vld [vmem:[#allocation2 + $0x18] sm:$0xff]  ;;  %v107_v22 = vunpack.c.0.s8 %v104_v15  ;;  %v108_v23 = vunpack.c.1.s8 %v104_v15  ;;  %s254_s17 = sshll.u32 %s504_s15, 4  ;;  %s505_s21 = smov [#allocation11]   ;;  %s670_s17 = int_to_ptr.vmem [resolvable:$true] %s254_s17 }
  0x51   :  { %v124_v24 = vld [vmem:[%s756_s0 + $0x18] sm:$0xff]  ;;  %v125_v25 = vmul.f32 0.001, %v121_v18  ;;  %v126_v26 = vmul.f32 0.001, %v122_v19  ;;  %vm109_vm2 = vcmp.ne.s32.totalorder %v105_v16, 0 }
  0x52   :  { %vm110_vm3 = vcmp.ne.s32.totalorder %v106_v17, 0  ;;  %v127_v27 = vmul.f32 0.001, %v123_v20  ;;  %v128_v28 = vmul.f32 0.001, %v124_v24  ;;  %vm111_vm4 = vcmp.ne.s32.totalorder %v107_v22, 0 }
  0x53   :  { %vm112_vm5 = vcmp.ne.s32.totalorder %v108_v23, 0  ;;  %v113_v29 = vsel %vm109_vm2, -75.0, %v87_v2  ;;  %v114_v30 = vsel %vm110_vm3, -75.0, %v88_v3  ;;  %v115_v31 = vsel %vm111_vm4, -75.0, %v89_v7  ;;  %v141_v39 = vld [vmem:[%s757_s1] sm:$0xff]  ;;  %v142_v40 = vld [vmem:[%s757_s1 + $0x8] sm:$0xff] }
  0x54   :  { %v116_v32 = vsel %vm112_vm5, -75.0, %v90_v21  ;;  %v117_v33 = vsel %vm109_vm2, 5.0, %v279_v9  ;;  %v118_v34 = vsel %vm110_vm3, 5.0, %v280_v10  ;;  %v119_v35 = vsel %vm111_vm4, 5.0, %v281_v11  ;;  %v143_v41 = vld [vmem:[%s757_s1 + $0x10] sm:$0xff]  ;;  %v144_v44 = vld [vmem:[%s757_s1 + $0x18] sm:$0xff] }
  0x55   :  { %v120_v36 = vsel %vm112_vm5, 5.0, %v282_v14  ;;  %v129_v37 = vadd.f32 %v125_v25, %v113_v29  ;;  %v130_v38 = vadd.f32 %v126_v26, %v114_v30  ;;  %205 = vst [vmem:[#allocation13] sm:$0xff] %v117_v33  ;;  %206 = vst [vmem:[#allocation13 + $0x8] sm:$0xff] %v118_v34  ;;  %v131_v42 = vadd.f32 %v127_v27, %v115_v31  ;;  %v165_v45 = vld [vmem:[#allocation8] sm:$0xff]  ;;  %v166_v46 = vld [vmem:[#allocation8 + $0x8] sm:$0xff]  ;;  %s502_s1 = smov [#allocation10]  }
  0x56   :  { %v132_v43 = vadd.f32 %v128_v28, %v116_v32  ;;  %vm133_vm6 = vcmp.le.f32.partialorder %v117_v33, 0.0  ;;  %vm134_vm7 = vcmp.le.f32.partialorder %v118_v34, 0.0  ;;  %207 = vst [vmem:[#allocation13 + $0x10] sm:$0xff] %v119_v35  ;;  %208 = vst [vmem:[#allocation13 + $0x18] sm:$0xff] %v120_v36  ;;  %vm135_vm8 = vcmp.le.f32.partialorder %v119_v35, 0.0  ;;  %s650_s14 = sshll.u32 %s502_s1, 4  ;;  %s665_s14 = int_to_ptr.vmem [resolvable:$true] %s650_s14 }
  0x57   :  { %vm136_vm9 = vcmp.le.f32.partialorder %v120_v36, 0.0  ;;  %v137_v47 = vsel %vm133_vm6, %v129_v37, %v113_v29  ;;  %v138_v48 = vsel %vm134_vm7, %v130_v38, %v114_v30  ;;  %v139_v49 = vsel %vm135_vm8, %v131_v42, %v115_v31  ;;  %v167_v61 = vld [vmem:[#allocation8 + $0x10] sm:$0xff]  ;;  %v168_v7 = vld [vmem:[#allocation8 + $0x18] sm:$0xff]  ;;  %s230_s4 = sshll.u32 %s505_s21, 4  ;;  %s393_s16 = scalar_lea.vmem %s665_s14, 512  ;;  %s692_s4 = int_to_ptr.vmem [resolvable:$true] %s230_s4 }
  0x58   :  { %v140_v50 = vsel %vm136_vm9, %v132_v43, %v116_v32  ;;  %v145_v51 = vadd.f32 %v141_v39, %v137_v47  ;;  %v146_v52 = vadd.f32 %v142_v40, %v138_v48  ;;  %v147_v53 = vadd.f32 %v143_v41, %v139_v49  ;;  %p394_p4 = scmp.ne.s32.totalorder %s665_s14, %s393_s16  ;;  %p398_p5 = scmp.lt.s32.totalorder %s665_s14, %s665_s14 }
  0x59   :  { %v148_v54 = vadd.f32 %v144_v44, %v140_v50  ;;  %v169_v55 = vmul.f32 0.9048374, %v165_v45  ;;  %v170_v56 = vmul.f32 0.9048374, %v166_v46  ;;  %v171_v13 = vmul.f32 0.9048374, %v167_v61  ;;  %p399_p6 = scmp.lt.s32.totalorder %s393_s16, %s393_s16 }
  0x5a   :  { %vm149_vm10 = vcmp.gt.f32.partialorder %v145_v51, 0.0  ;;  %vm150_vm11 = vcmp.gt.f32.partialorder %v146_v52, 0.0  ;;  %v283_v57 = vadd.f32 70.0, %v145_v51  ;;  %v284_v58 = vadd.f32 70.0, %v146_v52 }
  0x5b   :  { %vm151_vm12 = vcmp.gt.f32.partialorder %v147_v53, 0.0  ;;  %vm152_vm13 = vcmp.gt.f32.partialorder %v148_v54, 0.0  ;;  %v285_v59 = vadd.f32 70.0, %v147_v53  ;;  %v286_v60 = vadd.f32 70.0, %v148_v54  ;;  %p400_p7 = por %p399_p6, %p398_p5 }
  0x5c   :  { %vm189_vm14 = vmpackc.low %vm151_vm12, %vm149_vm10  ;;  %v157_v62 = vmul.f32 0.1, %v283_v57  ;;  %v158_v63 = vmul.f32 0.1, %v284_v58  ;;  %v287_v1 = vsel %vm149_vm10, 1.0, %v503_v0  ;;  %v288_v2 = vsel %vm150_vm11, 1.0, %v503_v0 }
  0x5d   :  { %vm190_vm15 = vmpackc.even %vm189_vm14, %vm189_vm14  ;;  %v159_v3 = vmul.f32 0.1, %v285_v59  ;;  %v160_v4 = vmul.f32 0.1, %v286_v60  ;;  %v181_v5 = vadd.f32 %v287_v1, %v169_v55  ;;  %v182_v6 = vadd.f32 %v288_v2, %v170_v56  ;;  %p401_p8 = pnand %p400_p7, %p394_p4 }
  0x5e   :  { %vm656_vm0 = vmpackc.low %vm152_vm13, %vm150_vm11  ;;  %v193_v9 = vsel %vm190_vm15, 16843009, %v501_v12  ;;  %v161_v10 = vsub.f32 %v145_v51, %v157_v62  ;;  %v162_v11 = vsub.f32 %v146_v52, %v158_v63  ;;  %v289_v19 = vsel %vm151_vm12, 1.0, %v503_v0 }
  0x5f   :  { %vm192_vm1 = vmpackc.even %vm656_vm0, %vm656_vm0  ;;  %v195_v14 = vunpack.c.0.s8 %v193_v9  ;;  %v197_v15 = vunpack.c.1.s8 %v193_v9  ;;  %v163_v16 = vsub.f32 %v147_v53, %v159_v3  ;;  %v164_v17 = vsub.f32 %v148_v54, %v160_v4  ;;  %209 = vst [vmem:[#allocation14] sm:$0xff] %v181_v5 }
  0x60   :  { %210 = vst [vmem:[#allocation14 + $0x8] sm:$0xff] %v182_v6  ;;  %v194_v18 = vsel %vm192_vm1, 16843009, %v501_v12  ;;  %185 = vst [vmem:[#allocation10] sm:$0xff] %v161_v10  ;;  %v172_v20 = vmul.f32 0.9048374, %v168_v7  ;;  %v183_v24 = vadd.f32 %v289_v19, %v171_v13 }
  0x61   :  { %186 = vst [vmem:[#allocation10 + $0x8] sm:$0xff] %v162_v11  ;;  %v290_v21 = vsel %vm152_vm13, 1.0, %v503_v0  ;;  %v196_v22 = vunpack.c.0.s8 %v194_v18  ;;  %v198_v23 = vunpack.c.1.s8 %v194_v18  ;;  %187 = vst [vmem:[#allocation10 + $0x10] sm:$0xff] %v163_v16 }
  0x62   :  { %188 = vst [vmem:[#allocation10 + $0x18] sm:$0xff] %v164_v17  ;;  %v184_v25 = vadd.f32 %v290_v21, %v172_v20 }
  0x63   :  { %404 = shalt.err (!%p401_p8)
}
  0x64   :  { %s405_s22 = scalar_lea.hbm %s762_s6, 512 }
  0x65   :  { %p406_p9 = scmp.ne.s32.totalorder %s762_s6, %s405_s22  ;;  %p409_p10 = scmp.lt.u32.totalorder %s405_s22, %s762_s6 }
  0x67   :  { %p411_p11 = pnand %p409_p10, %p406_p9 }
  0x69   :  { %414 = shalt.err (!%p411_p11)
}
  0x6a   :  { %224 = dma.vmem_to_hbm [thread:$0]  %s665_s14, 512, %s762_s6, [#allocation4], %s497_s3, %s497_s3, %s498_s10   ;;  %v199_v12 = vpack.c.b16 %v196_v22, %v195_v14  ;;  %v201_v26 = vpack.c.b16 %v198_v23, %v197_v15  ;;  %211 = vst [vmem:[#allocation14 + $0x10] sm:$0xff] %v183_v24  ;;  %212 = vst [vmem:[#allocation14 + $0x18] sm:$0xff] %v184_v25 }
  0x6b   :  { %s506_s0 = smov [#allocation13]   ;;  %s415_s29 = scalar_lea.vmem %s670_s17, 512 }
  0x6c   :  { %s242_s24 = sshll.u32 %s506_s0, 4  ;;  %v200_v27 = vpack.c.b8 %v199_v12, %v199_v12  ;;  %v202_v28 = vpack.c.b8 %v201_v26, %v201_v26  ;;  %p416_p12 = scmp.ne.s32.totalorder %s670_s17, %s415_s29  ;;  %s714_s24 = int_to_ptr.vmem [resolvable:$true] %s242_s24 }
  0x6d   :  { %p420_p13 = scmp.lt.s32.totalorder %s670_s17, %s670_s17  ;;  %p421_p0 = scmp.lt.s32.totalorder %s415_s29, %s415_s29 }
  0x6f   :  { %p422_p1 = por %p421_p0, %p420_p13 }
  0x71   :  { %p423_p2 = pnand %p422_p1, %p416_p12 }
  0x73   :  { %426 = shalt.err (!%p423_p2)
}
  0x74   :  { %s427_s11 = scalar_lea.hbm %s765_s9, 512 }
  0x75   :  { %p428_p3 = scmp.ne.s32.totalorder %s765_s9, %s427_s11  ;;  %p431_p4 = scmp.lt.u32.totalorder %s427_s11, %s765_s9 }
  0x77   :  { %p433_p5 = pnand %p431_p4, %p428_p3 }
  0x79   :  { %436 = shalt.err (!%p433_p5)
}
  0x7a   :  { %260 = dma.vmem_to_hbm [thread:$0]  %s670_s17, 512, %s765_s9, [#allocation15], %s497_s3, %s497_s3, %s498_s10   ;;  %203 = vst [vmem:[#allocation11] sm:$0xf] %v200_v27  ;;  %204 = vst [vmem:[#allocation11 + $0x4] sm:$0xf] %v202_v28 }
  0x7b   :  { %s437_s16 = scalar_lea.vmem %s692_s4, 128  ;;  %p442_p7 = scmp.lt.s32.totalorder %s692_s4, %s692_s4 }
  0x7c   :  { %p438_p6 = scmp.ne.s32.totalorder %s692_s4, %s437_s16  ;;  %p443_p8 = scmp.lt.s32.totalorder %s437_s16, %s437_s16 }
  0x7e   :  { %p444_p9 = por %p443_p8, %p442_p7 }
  0x80   :  { %p445_p10 = pnand %p444_p9, %p438_p6 }
  0x82   :  { %448 = shalt.err (!%p445_p10)
}
  0x83   :  { %s449_s22 = scalar_lea.hbm %s763_s7, 128 }
  0x84   :  { %p450_p11 = scmp.ne.s32.totalorder %s763_s7, %s449_s22  ;;  %p453_p12 = scmp.lt.u32.totalorder %s449_s22, %s763_s7 }
  0x86   :  { %p455_p13 = pnand %p453_p12, %p450_p11 }
  0x88   :  { %458 = shalt.err (!%p455_p13)
}
  0x89   :  { %236 = dma.vmem_to_hbm [thread:$0]  %s692_s4, 128, %s763_s7, [#allocation12], %s494_s19, %s494_s19, %s495_s20  }
  0x8a   :  { %s459_s28 = scalar_lea.vmem %s714_s24, 512  ;;  %p464_p1 = scmp.lt.s32.totalorder %s714_s24, %s714_s24 }
  0x8b   :  { %p460_p0 = scmp.ne.s32.totalorder %s714_s24, %s459_s28  ;;  %p465_p2 = scmp.lt.s32.totalorder %s459_s28, %s459_s28 }
  0x8d   :  { %p466_p3 = por %p465_p2, %p464_p1 }
  0x8f   :  { %p467_p4 = pnand %p466_p3, %p460_p0 }
  0x91   :  { %470 = shalt.err (!%p467_p4)
}
  0x92   :  { %s471_s29 = scalar_lea.hbm %s764_s8, 512 }
  0x93   :  { %p472_p5 = scmp.ne.s32.totalorder %s764_s8, %s471_s29  ;;  %p475_p6 = scmp.lt.u32.totalorder %s471_s29, %s764_s8 }
  0x95   :  { %p477_p7 = pnand %p475_p6, %p472_p5 }
  0x97   :  { %480 = shalt.err (!%p477_p7)
}
  0x98   :  { %248 = dma.vmem_to_hbm [thread:$0]  %s714_s24, 512, %s764_s8, [#allocation12], %s497_s3, %s497_s3, %s498_s10  }
  0x99   :  { %487 = dma.done.wait [#allocation4], 512  }
  0x9a   :  { %488 = vsyncadd [#allocation4], 4294966784 }
  0x9b   :  { %489 = dma.done.wait [#allocation12], 640  }
  0x9c   :  { %490 = vsyncadd [#allocation12], 4294966656 }
  0x9d   :  { %491 = dma.done.wait [#allocation15], 512  }
  0x9e   :  { %492 = vsyncadd [#allocation15], 4294966784 }
  0x9f   :  { %273 = vsyncpa [#allocation3], 1 }
  0xa0   :  { %274 = vsyncpa [#allocation6], 1 }
  0xa1   :  { %275 = vsyncpa [#allocation9], 1 }
  0xa2   :  { %276 = vsyncpa [#allocation4], 1 }
  0xa3   :  { %277 = vsyncpa [#allocation12], 1 }
  0xa4   :  { %278 = vsyncpa [#allocation15], 1 }

</bundles_post_ra>
